<compile_context>
chip_gen: v5e
topology: v5e:2x2
jax: 0.10.0
libtpu: 0.0.40
codegen_flags: <defaults>
</compile_context>

<pallas_src>
import jax
import jax.numpy as jnp
from jax.experimental import pallas as pl
from jax.experimental.pallas import tpu as pltpu


def _round_up(x, m):
    return (x + m - 1) // m * m


def _linear_kernel(x_ref, w_ref, b_ref, o_ref, acc_ref):
    # x_ref: (tm, tk)  w_ref: (tk, tn)  b_ref: (1, tn)  o_ref: (tm, tn)
    k = pl.program_id(2)

    @pl.when(k == 0)
    def _init():
        acc_ref[...] = jnp.zeros_like(acc_ref)

    acc_ref[...] += jnp.dot(x_ref[...], w_ref[...],
                            preferred_element_type=jnp.float32)

    @pl.when(k == pl.num_programs(2) - 1)
    def _finalize():
        # Bias added once, on the final reduction step only.
        o_ref[...] = (acc_ref[...] + b_ref[...]).astype(o_ref.dtype)


@jax.jit
def linear_forward(x, w_io, bias_2d):
    """x: [M, K]; w_io: [K, N] (pre-transposed at param creation); bias_2d: [1, N]."""
    M, K = x.shape
    K2, N = w_io.shape
    assert K == K2, "weight inner dim must match x feature dim"

    # Tile plan: sublane-/lane-dense blocks, sized for the v7x 64 MiB VMEM
    # budget (double-buffered f32 input tiles stay well under the scoped limit).
    tm = min(_round_up(M, 8), 256)
    tn = min(_round_up(N, 128), 256)
    tk = min(_round_up(K, 128), 512)

    M_p, N_p, K_p = _round_up(M, tm), _round_up(N, tn), _round_up(K, tk)

    # Zero-pad to tile multiples: padded K contributes zeros to the dot,
    # padded M rows / N lanes are sliced off below. Keeps output stores
    # lane-dense (no masked vst.msk).
    x_p = jnp.pad(x, ((0, M_p - M), (0, K_p - K))) if (M_p, K_p) != (M, K) else x
    w_p = jnp.pad(w_io, ((0, K_p - K), (0, N_p - N))) if (K_p, N_p) != (K, N) else w_io
    b_p = jnp.pad(bias_2d, ((0, 0), (0, N_p - N))) if N_p != N else bias_2d

    grid = (M_p // tm, N_p // tn, K_p // tk)

    out_p = pl.pallas_call(
        _linear_kernel,
        out_shape=jax.ShapeDtypeStruct((M_p, N_p), x.dtype),
        grid_spec=pltpu.PrefetchScalarGridSpec(
            num_scalar_prefetch=0,
            grid=grid,
            in_specs=[
                pl.BlockSpec((tm, tk), lambda i, j, k: (i, k)),
                pl.BlockSpec((tk, tn), lambda i, j, k: (k, j)),
                pl.BlockSpec((1, tn), lambda i, j, k: (0, j)),
            ],
            out_specs=pl.BlockSpec((tm, tn), lambda i, j, k: (i, j)),
            scratch_shapes=[pltpu.VMEM((tm, tn), jnp.float32)],
        ),
        compiler_params=pltpu.CompilerParams(
            dimension_semantics=("parallel", "parallel", "arbitrary"),
            vmem_limit_bytes=64 * 1024 * 1024,
        ),
    )(x_p, w_p, b_p)

    return out_p[:M, :N]


if __name__ == "__main__":
    # Small shapes consistent with the module's forward: x: [batch, input_size]
    batch, input_size, output_size = 2, 32, 8

    key = jax.random.PRNGKey(0)
    kx, kw, kb = jax.random.split(key, 3)

    # Deterministic PyTorch-style nn.Linear uniform init, in the torch
    # convention weight: [Out, In], bias: [Out].
    bound = 1.0 / (input_size ** 0.5)
    weight = jax.random.uniform(kw, (output_size, input_size),
                                minval=-bound, maxval=bound, dtype=jnp.float32)
    bias = jax.random.uniform(kb, (output_size,),
                              minval=-bound, maxval=bound, dtype=jnp.float32)
    x = jax.random.normal(kx, (batch, input_size), dtype=jnp.float32)

    # Parameter preparation done ONCE (not per forward call): store the weight
    # pre-transposed as [In, Out] and the bias as [1, Out].
    w_io = jnp.asarray(weight.T)
    bias_2d = bias.reshape(1, output_size)

    out = linear_forward(x, w_io, bias_2d)
    jax.block_until_ready(out)

    # Cross-check against plain JAX reference (torch semantics: x @ W^T + b).
    ref = x @ weight.T + bias
    assert out.shape == (batch, output_size)
    assert jnp.allclose(out, ref, atol=1e-5, rtol=1e-5)

    print("KERNEL_OK")
</pallas_src>

<mosaic_0001>
module attributes {stable_mosaic.version = 11 : i64} {
  func.func @_linear_kernel(%arg0: i32, %arg1: i32, %arg2: i32, %arg3: memref<8x128xf32, #tpu.memory_space<vmem>>, %arg4: memref<128x128xf32, #tpu.memory_space<vmem>>, %arg5: memref<1x128xf32, #tpu.memory_space<vmem>>, %arg6: memref<8x128xf32, #tpu.memory_space<vmem>>, %arg7: memref<8x128xf32, #tpu.memory_space<vmem>>) attributes {dimension_semantics = [#tpu.dimension_semantics<parallel>, #tpu.dimension_semantics<parallel>, #tpu.dimension_semantics<arbitrary>], iteration_bounds = array<i64: 1, 1, 1>, scalar_prefetch = 0 : i64, scratch_operands = 1 : i64, tpu.core_type = #tpu.core_type<tc>, window_params = [{transform_indices = @transform_0, window_bounds = array<i64: 8, 128>}, {transform_indices = @transform_1, window_bounds = array<i64: 128, 128>}, {transform_indices = @transform_2, window_bounds = array<i64: 1, 128>}, {transform_indices = @transform_3, window_bounds = array<i64: 8, 128>}]} {
    %c0_i32 = arith.constant 0 : i32
    %0 = arith.cmpi eq, %arg2, %c0_i32 : i32
    %1 = arith.extui %0 : i1 to i32
    %c0_i32_0 = arith.constant 0 : i32
    %2 = arith.cmpi ne, %1, %c0_i32_0 : i32
    scf.if %2 {
      %cst_10 = arith.constant 0.000000e+00 : f32
      %12 = vector.broadcast %cst_10 : f32 to vector<8x128xf32>
      %c0_11 = arith.constant 0 : index
      %c0_12 = arith.constant 0 : index
      %13 = vector.load %arg7[%c0_11, %c0_12] : memref<8x128xf32, #tpu.memory_space<vmem>>, vector<8x128xf32>
      tpu.vector_store %arg7[%c0_11, %c0_12], %12 {strides = array<i32>} : memref<8x128xf32, #tpu.memory_space<vmem>>, vector<8x128xf32>,
    } else {
    }
    %c0 = arith.constant 0 : index
    %c0_1 = arith.constant 0 : index
    %3 = vector.load %arg7[%c0, %c0_1] : memref<8x128xf32, #tpu.memory_space<vmem>>, vector<8x128xf32>
    %c0_2 = arith.constant 0 : index
    %c0_3 = arith.constant 0 : index
    %4 = vector.load %arg3[%c0_2, %c0_3] : memref<8x128xf32, #tpu.memory_space<vmem>>, vector<8x128xf32>
    %c0_4 = arith.constant 0 : index
    %c0_5 = arith.constant 0 : index
    %5 = vector.load %arg4[%c0_4, %c0_5] : memref<128x128xf32, #tpu.memory_space<vmem>>, vector<128x128xf32>
    %cst = arith.constant dense<0.000000e+00> : vector<8x128xf32>
    %6 = tpu.matmul %4, %5, %cst {dimension_numbers = #tpu.dot_dimension_numbers<[1], [0], [0], [1], [0, 0, 1, 1], [], []>} : vector<8x128xf32>, vector<128x128xf32>, vector<8x128xf32> -> vector<8x128xf32>
    %7 = arith.addf %3, %6 : vector<8x128xf32>
    %c0_6 = arith.constant 0 : index
    %c0_7 = arith.constant 0 : index
    %8 = vector.load %arg7[%c0_6, %c0_7] : memref<8x128xf32, #tpu.memory_space<vmem>>, vector<8x128xf32>
    tpu.vector_store %arg7[%c0_6, %c0_7], %7 {strides = array<i32>} : memref<8x128xf32, #tpu.memory_space<vmem>>, vector<8x128xf32>,
    %c0_i32_8 = arith.constant 0 : i32
    %9 = arith.cmpi eq, %arg2, %c0_i32_8 : i32
    %10 = arith.extui %9 : i1 to i32
    %c0_i32_9 = arith.constant 0 : i32
    %11 = arith.cmpi ne, %10, %c0_i32_9 : i32
    scf.if %11 {
      %c0_10 = arith.constant 0 : index
      %c0_11 = arith.constant 0 : index
      %12 = vector.load %arg7[%c0_10, %c0_11] : memref<8x128xf32, #tpu.memory_space<vmem>>, vector<8x128xf32>
      %c0_12 = arith.constant 0 : index
      %c0_13 = arith.constant 0 : index
      %13 = vector.load %arg5[%c0_12, %c0_13] : memref<1x128xf32, #tpu.memory_space<vmem>>, vector<1x128xf32>
      %14 = vector.broadcast %13 : vector<1x128xf32> to vector<8x128xf32>
      %15 = arith.addf %12, %14 : vector<8x128xf32>
      %c0_14 = arith.constant 0 : index
      %c0_15 = arith.constant 0 : index
      %16 = vector.load %arg6[%c0_14, %c0_15] : memref<8x128xf32, #tpu.memory_space<vmem>>, vector<8x128xf32>
      tpu.vector_store %arg6[%c0_14, %c0_15], %15 {strides = array<i32>} : memref<8x128xf32, #tpu.memory_space<vmem>>, vector<8x128xf32>,
    } else {
    }
    return
  }
  func.func @transform_0(%arg0: i32, %arg1: i32, %arg2: i32) -> (i32, i32) {
    %c0_i32 = arith.constant 0 : i32
    return %arg0, %arg2 : i32, i32
  }
  func.func @transform_1(%arg0: i32, %arg1: i32, %arg2: i32) -> (i32, i32) {
    %c0_i32 = arith.constant 0 : i32
    return %arg2, %arg1 : i32, i32
  }
  func.func @transform_2(%arg0: i32, %arg1: i32, %arg2: i32) -> (i32, i32) {
    %c0_i32 = arith.constant 0 : i32
    %c0_i32_0 = arith.constant 0 : i32
    return %c0_i32, %arg1 : i32, i32
  }
  func.func @transform_3(%arg0: i32, %arg1: i32, %arg2: i32) -> (i32, i32) {
    %c0_i32 = arith.constant 0 : i32
    return %arg0, %arg1 : i32, i32
  }
}

</mosaic_0001>

<bundles_post_ra>
// kernel: linear_forward.1
= control target key start
LH: loop header
LB: loop body
LE: loop exit
PB: predicated region body
PF: predicated region fallthrough
CT: control target
= control target key end

     0   :  { %s151_s1 = inlined_call_operand.vmem [shape: f32[128,128], index: 1, kind: input, shape index: {}]   ;;  %s152_s2 = inlined_call_operand.vmem [shape: f32[1,128], index: 2, kind: input, shape index: {}]   ;;  %s153_s0 = inlined_call_operand.vmem [shape: f32[8,128], index: 0, kind: input, shape index: {}]   ;;  %s154_s3 = inlined_call_operand.vmem [shape: f32[8,128], index: 3, kind: output, shape index: {}]  }
   0x1   :  { %v36_v0 = vld [vmem:[%s151_s1 + $0x78] sm:$0xff]  ;;  %v35_v1 = vld [vmem:[%s151_s1 + $0x70] sm:$0xff]  ;;  %v34_v2 = vld [vmem:[%s151_s1 + $0x68] sm:$0xff] }
   0x2   :  { %37 = vmatpush.msra.mxu0 %v36_v0  ;;  %v33_v3 = vld [vmem:[%s151_s1 + $0x60] sm:$0xff]  ;;  %v32_v4 = vld [vmem:[%s151_s1 + $0x58] sm:$0xff]  ;;  %v31_v5 = vld [vmem:[%s151_s1 + $0x50] sm:$0xff] }
   0x3   :  { %v30_v6 = vld [vmem:[%s151_s1 + $0x48] sm:$0xff]  ;;  %v29_v7 = vld [vmem:[%s151_s1 + $0x40] sm:$0xff]  ;;  %v28_v8 = vld [vmem:[%s151_s1 + $0x38] sm:$0xff] }
   0x4   :  { %38 = vmatpush.msra.mxu0 %v35_v1  ;;  %v27_v9 = vld [vmem:[%s151_s1 + $0x30] sm:$0xff]  ;;  %v26_v10 = vld [vmem:[%s151_s1 + $0x28] sm:$0xff]  ;;  %v25_v11 = vld [vmem:[%s151_s1 + $0x20] sm:$0xff] }
   0x5   :  { %v24_v12 = vld [vmem:[%s151_s1 + $0x18] sm:$0xff]  ;;  %v23_v13 = vld [vmem:[%s151_s1 + $0x10] sm:$0xff]  ;;  %v22_v14 = vld [vmem:[%s151_s1 + $0x8] sm:$0xff] }
   0x6   :  { %39 = vmatpush.msra.mxu0 %v34_v2  ;;  %v21_v15 = vld [vmem:[%s151_s1] sm:$0xff] }
   0x7   :  { %v20_v16 = vld [vmem:[%s153_s0] sm:$0xff] }
   0x8   :  { %40 = vmatpush.msra.mxu0 %v33_v3  ;;  %v73_v17 = vld [vmem:[%s152_s2] ss:$0 sm:$0xff] }
   0xa   :  { %41 = vmatpush.msra.mxu0 %v32_v4 }
   0xc   :  { %42 = vmatpush.msra.mxu0 %v31_v5 }
   0xe   :  { %43 = vmatpush.msra.mxu0 %v30_v6 }
  0x10   :  { %44 = vmatpush.msra.mxu0 %v29_v7 }
  0x12   :  { %45 = vmatpush.msra.mxu0 %v28_v8 }
  0x14   :  { %46 = vmatpush.msra.mxu0 %v27_v9 }
  0x16   :  { %47 = vmatpush.msra.mxu0 %v26_v10 }
  0x18   :  { %48 = vmatpush.msra.mxu0 %v25_v11 }
  0x1a   :  { %49 = vmatpush.msra.mxu0 %v24_v12 }
  0x1c   :  { %50 = vmatpush.msra.mxu0 %v23_v13 }
  0x1e   :  { %51 = vmatpush.msra.mxu0 %v22_v14 }
  0x20   :  { %52 = vmatpush.msra.mxu0 %v21_v15 }
  0x21   :  { %53 = vmatmul.f32.vlgmr.msra.gmra.mxu0 %v20_v16 }
  0x9e   :  { %v54_v18 = vpop.f32.mrf.mxu0 }
  0x9f   :  { %v67_v19 = vadd.f32 %v73_v17, %v54_v18 }
  0xa1   :  { %68 = vst [vmem:[%s154_s3] sm:$0xff] %v67_v19 }

</bundles_post_ra>
